<compile_context>
chip_gen: v7x
topology: tpu7x:2x2x1
jax: 0.10.0
libtpu: 0.0.40
codegen_flags: <defaults>
</compile_context>

<pallas_src>
import functools

import jax
import jax.numpy as jnp
from jax.experimental import pallas as pl
from jax.experimental.pallas import tpu as pltpu


# ----------------------------- Pallas kernel -------------------------------
def _fused_decoder_kernel(*refs, num_layers):
    """Fused MLP: sigmoid(Wn(...relu(W1(z@Wz + c@Wc + b0))...) + bn).

    refs layout: z, cond, Wz, Wc, b0, (W_i, b_i) for i=1..num_layers-1, out.
    All weights are (in, out); biases are (1, out). The last layer's weight /
    bias / output are zero-padded along the output dim to a multiple of 128.
    """
    o_ref = refs[-1]
    z_ref, c_ref = refs[0], refs[1]
    wz_ref, wc_ref, b0_ref = refs[2], refs[3], refs[4]

    # First layer: concat folded into two small MXU dots.
    h = jnp.dot(z_ref[...], wz_ref[...], preferred_element_type=jnp.float32)
    h = h + jnp.dot(c_ref[...], wc_ref[...], preferred_element_type=jnp.float32)
    h = h + b0_ref[...]
    if num_layers > 1:
        h = jnp.maximum(h, 0.0)

    # Remaining layers (unrolled at trace time; all operands VMEM-resident).
    idx = 5
    for i in range(1, num_layers):
        w_ref, b_ref = refs[idx], refs[idx + 1]
        idx += 2
        h = jnp.dot(h, w_ref[...], preferred_element_type=jnp.float32) + b_ref[...]
        if i + 1 < num_layers:
            h = jnp.maximum(h, 0.0)

    # Final activation: Sigmoid (EUP path).
    h = jax.nn.sigmoid(h)
    o_ref[...] = h.astype(o_ref.dtype)


def _fused_forward(z, condition, flat_params, *, num_layers, out_dim, out_dim_padded):
    """Single pallas_call over whole arrays (everything fits VMEM)."""
    batch = z.shape[0]
    n_inputs = 2 + len(flat_params)
    out = pl.pallas_call(
        functools.partial(_fused_decoder_kernel, num_layers=num_layers),
        out_shape=jax.ShapeDtypeStruct((batch, out_dim_padded), jnp.float32),
        in_specs=[pl.BlockSpec(memory_space=pltpu.MemorySpace.VMEM)] * n_inputs,
        out_specs=pl.BlockSpec(memory_space=pltpu.MemorySpace.VMEM),
    )(z, condition, *flat_params)
    # Pure glue: drop lane padding, reshape to images.
    return out[:, :out_dim].reshape(-1, 28, 28)


# ------------------------------ Decoder model ------------------------------
class Decoder:
    """Mirrors the PyTorch Decoder: MLP over cat(z, condition), ReLU between
    hidden layers, Sigmoid on the last, output reshaped to (-1, 28, 28)."""

    def __init__(self, layer_sizes, latent_size, num_conditions, key):
        self.num_layers = len(layer_sizes)
        self.latent_size = latent_size
        self.num_conditions = num_conditions
        self.out_dim = layer_sizes[-1]
        self.out_dim_padded = pl.cdiv(self.out_dim, 128) * 128  # lane-dense store

        in_sizes = [latent_size + num_conditions] + list(layer_sizes[:-1])

        # Raw (PyTorch-layout) params for the pure-JAX reference.
        self.raw_params = []
        for in_size, out_size in zip(in_sizes, layer_sizes):
            key, kw, kb = jax.random.split(key, 3)
            bound = 1.0 / jnp.sqrt(jnp.float32(in_size))  # nn.Linear default init
            w = jax.random.uniform(kw, (out_size, in_size), jnp.float32, -bound, bound)
            b = jax.random.uniform(kb, (out_size,), jnp.float32, -bound, bound)
            self.raw_params.append((w, b))

        # Kernel params: pre-transposed to (in, out), bias as (1, out), first
        # layer split into (W_z, W_c), last layer zero-padded to out_dim_padded.
        flat = []
        for i, (w, b) in enumerate(self.raw_params):
            wt = w.T  # (in, out)
            bt = b[None, :]  # (1, out)
            if i == self.num_layers - 1:
                pad = self.out_dim_padded - wt.shape[1]
                if pad:
                    wt = jnp.pad(wt, ((0, 0), (0, pad)))
                    bt = jnp.pad(bt, ((0, 0), (0, pad)))
            if i == 0:
                flat += [wt[:latent_size], wt[latent_size:], bt]  # Wz, Wc, b0
            else:
                flat += [wt, bt]
        self.flat_params = tuple(flat)

        # Jitted forward (static layer count / padding).
        self._forward = jax.jit(
            functools.partial(
                _fused_forward,
                num_layers=self.num_layers,
                out_dim=self.out_dim,
                out_dim_padded=self.out_dim_padded,
            )
        )

    def __call__(self, z, condition):
        return self._forward(
            z.astype(jnp.float32), condition.astype(jnp.float32), self.flat_params
        )

    # Pure-JAX reference for correctness checking.
    def reference(self, z, condition):
        x = jnp.concatenate([z, condition], axis=-1).astype(jnp.float32)
        for i, (w, b) in enumerate(self.raw_params):
            x = x @ w.T + b
            if (i + 1) < self.num_layers:
                x = jnp.maximum(x, 0.0)
            else:
                x = jax.nn.sigmoid(x)
        return x.reshape(-1, 28, 28)


# ---------------------------------- main -----------------------------------
if __name__ == "__main__":
    key = jax.random.PRNGKey(0)
    k_params, k_z, k_c = jax.random.split(key, 3)

    batch = 2
    latent_size = 8
    num_conditions = 10
    layer_sizes = [256, 784]  # final layer must be 784 = 28*28

    decoder = Decoder(layer_sizes, latent_size, num_conditions, k_params)

    z = jax.random.normal(k_z, (batch, latent_size), jnp.float32)
    # one-hot style condition (like a class label), deterministic
    cond_idx = jax.random.randint(k_c, (batch,), 0, num_conditions)
    condition = jax.nn.one_hot(cond_idx, num_conditions, dtype=jnp.float32)

    out = decoder(z, condition)
    out = jax.block_until_ready(out)

    ref = decoder.reference(z, condition)
    assert out.shape == (batch, 28, 28), out.shape
    assert jnp.allclose(out, ref, atol=1e-5, rtol=1e-5), float(
        jnp.max(jnp.abs(out - ref))
    )

    print("KERNEL_OK")
</pallas_src>

<mosaic_0001>
module attributes {stable_mosaic.version = 11 : i64} {
  func.func @_fused_decoder_kernel(%arg0: memref<2x8xf32, #tpu.memory_space<vmem>>, %arg1: memref<2x10xf32, #tpu.memory_space<vmem>>, %arg2: memref<8x256xf32, #tpu.memory_space<vmem>>, %arg3: memref<10x256xf32, #tpu.memory_space<vmem>>, %arg4: memref<1x256xf32, #tpu.memory_space<vmem>>, %arg5: memref<256x896xf32, #tpu.memory_space<vmem>>, %arg6: memref<1x896xf32, #tpu.memory_space<vmem>>, %arg7: memref<2x896xf32, #tpu.memory_space<vmem>>) attributes {dimension_semantics = [], scalar_prefetch = 0 : i64, scratch_operands = 0 : i64, tpu.core_type = #tpu.core_type<tc>} {
    %c0 = arith.constant 0 : index
    %c0_0 = arith.constant 0 : index
    %0 = vector.load %arg0[%c0, %c0_0] : memref<2x8xf32, #tpu.memory_space<vmem>>, vector<2x8xf32>
    %c0_1 = arith.constant 0 : index
    %c0_2 = arith.constant 0 : index
    %1 = vector.load %arg2[%c0_1, %c0_2] : memref<8x256xf32, #tpu.memory_space<vmem>>, vector<8x256xf32>
    %cst = arith.constant dense<0.000000e+00> : vector<2x256xf32>
    %2 = tpu.matmul %0, %1, %cst {dimension_numbers = #tpu.dot_dimension_numbers<[1], [0], [0], [1], [0, 0, 1, 1], [], []>} : vector<2x8xf32>, vector<8x256xf32>, vector<2x256xf32> -> vector<2x256xf32>
    %c0_3 = arith.constant 0 : index
    %c0_4 = arith.constant 0 : index
    %3 = vector.load %arg1[%c0_3, %c0_4] : memref<2x10xf32, #tpu.memory_space<vmem>>, vector<2x10xf32>
    %c0_5 = arith.constant 0 : index
    %c0_6 = arith.constant 0 : index
    %4 = vector.load %arg3[%c0_5, %c0_6] : memref<10x256xf32, #tpu.memory_space<vmem>>, vector<10x256xf32>
    %cst_7 = arith.constant dense<0.000000e+00> : vector<2x256xf32>
    %5 = tpu.matmul %3, %4, %cst_7 {dimension_numbers = #tpu.dot_dimension_numbers<[1], [0], [0], [1], [0, 0, 1, 1], [], []>} : vector<2x10xf32>, vector<10x256xf32>, vector<2x256xf32> -> vector<2x256xf32>
    %6 = arith.addf %2, %5 : vector<2x256xf32>
    %c0_8 = arith.constant 0 : index
    %c0_9 = arith.constant 0 : index
    %7 = vector.load %arg4[%c0_8, %c0_9] : memref<1x256xf32, #tpu.memory_space<vmem>>, vector<1x256xf32>
    %8 = vector.broadcast %7 : vector<1x256xf32> to vector<2x256xf32>
    %9 = arith.addf %6, %8 : vector<2x256xf32>
    %cst_10 = arith.constant 0.000000e+00 : f32
    %10 = vector.broadcast %cst_10 : f32 to vector<2x256xf32>
    %11 = arith.maximumf %9, %10 : vector<2x256xf32>
    %c0_11 = arith.constant 0 : index
    %c0_12 = arith.constant 0 : index
    %12 = vector.load %arg5[%c0_11, %c0_12] : memref<256x896xf32, #tpu.memory_space<vmem>>, vector<256x896xf32>
    %cst_13 = arith.constant dense<0.000000e+00> : vector<2x896xf32>
    %13 = tpu.matmul %11, %12, %cst_13 {dimension_numbers = #tpu.dot_dimension_numbers<[1], [0], [0], [1], [0, 0, 1, 1], [], []>} : vector<2x256xf32>, vector<256x896xf32>, vector<2x896xf32> -> vector<2x896xf32>
    %c0_14 = arith.constant 0 : index
    %c0_15 = arith.constant 0 : index
    %14 = vector.load %arg6[%c0_14, %c0_15] : memref<1x896xf32, #tpu.memory_space<vmem>>, vector<1x896xf32>
    %15 = vector.broadcast %14 : vector<1x896xf32> to vector<2x896xf32>
    %16 = arith.addf %13, %15 : vector<2x896xf32>
    %17 = arith.negf %16 : vector<2x896xf32>
    %18 = math.exp %17 : vector<2x896xf32>
    %cst_16 = arith.constant 1.000000e+00 : f32
    %19 = vector.broadcast %cst_16 : f32 to vector<2x896xf32>
    %20 = arith.addf %19, %18 : vector<2x896xf32>
    %21 = arith.divf %19, %20 : vector<2x896xf32>
    %c0_17 = arith.constant 0 : index
    %c0_18 = arith.constant 0 : index
    %22 = vector.load %arg7[%c0_17, %c0_18] : memref<2x896xf32, #tpu.memory_space<vmem>>, vector<2x896xf32>
    tpu.vector_store %arg7[%c0_17, %c0_18], %21 {strides = array<i32>} : memref<2x896xf32, #tpu.memory_space<vmem>>, vector<2x896xf32>,
    return
  }
}

</mosaic_0001>

<bundles_post_ra>
// kernel: _fused_forward.1
= control target key start
LH: loop header
LB: loop body
LE: loop exit
PB: predicated region body
PF: predicated region fallthrough
CT: control target
= control target key end

     0   :  { %12 = vsyncpa [#allocation3], 0  ;;  %s1444_s0 = inlined_call_operand.hbm [shape: f32[2,8], index: 0, kind: input, shape index: {}]   ;;  %s1445_s1 = inlined_call_operand.vmem [shape: f32[2,10], index: 1, kind: input, shape index: {}]   ;;  %s1446_s2 = inlined_call_operand.hbm [shape: f32[8,256], index: 2, kind: input, shape index: {}]   ;;  %s1447_s3 = inlined_call_operand.hbm [shape: f32[10,256], index: 3, kind: input, shape index: {}]   ;;  %s1448_s4 = inlined_call_operand.vmem [shape: f32[1,256], index: 4, kind: input, shape index: {}]   ;;  %s1449_s5 = inlined_call_operand.hbm [shape: f32[256,896], index: 5, kind: input, shape index: {}]   ;;  %s1450_s6 = inlined_call_operand.vmem [shape: f32[1,896], index: 6, kind: input, shape index: {}]   ;;  %s1451_s7 = inlined_call_operand.vmem [shape: f32[2,896], index: 7, kind: output, shape index: {}]  }
   0x1   :  { %13 = vsyncpa [#allocation5], 0 }
   0x2   :  { %14 = vsyncpa [#allocation8], 0  ;;  %s1306_s24 = smov [#allocation4]   ;;  %s1307_s26 = smov [#allocation2]  }
   0x3   :  { %s33_s25 = sshll.u32 %s1306_s24, 4  ;;  %s21_s27 = sshll.u32 %s1307_s26, 4  ;;  %s34_s25 = int_to_ptr.vmem [resolvable:$true] %s33_s25  ;;  %s22_s27 = int_to_ptr.vmem [resolvable:$true] %s21_s27 }
   0x4   :  { %s1212_s30 = scalar_lea.hbm %s1446_s2, 256 }
   0x5   :  { %p1213_p0 = scmp.ne.s32.totalorder %s1446_s2, %s1212_s30  ;;  %p1216_p1 = scmp.lt.u32.totalorder %s1212_s30, %s1446_s2 }
   0x7   :  { %p1218_p2 = pnand %p1216_p1, %p1213_p0 }
   0x9   :  { %1221 = shalt.err (!%p1218_p2)
}
   0xa   :  { %s1222_s12 = scalar_lea.vmem %s34_s25, 256  ;;  %p1227_p4 = scmp.lt.s32.totalorder %s34_s25, %s34_s25 }
   0xb   :  { %p1223_p3 = scmp.ne.s32.totalorder %s34_s25, %s1222_s12  ;;  %p1228_p5 = scmp.lt.s32.totalorder %s1222_s12, %s1222_s12 }
   0xd   :  { %p1229_p6 = por %p1228_p5, %p1227_p4 }
   0xf   :  { %p1230_p7 = pnand %p1229_p6, %p1223_p3 }
  0x11   :  { %1233 = shalt.err (!%p1230_p7)
}
  0x12   :  { %36 = dma.hbm_to_vmem [thread:$0]  %s1446_s2, 256, %s34_s25, [#allocation5]  }
  0x13   :  { %s1234_s17 = scalar_lea.hbm %s1444_s0, 32 }
  0x14   :  { %p1235_p8 = scmp.ne.s32.totalorder %s1444_s0, %s1234_s17  ;;  %p1238_p9 = scmp.lt.u32.totalorder %s1234_s17, %s1444_s0 }
  0x16   :  { %p1240_p10 = pnand %p1238_p9, %p1235_p8 }
  0x18   :  { %1243 = shalt.err (!%p1240_p10)
}
  0x19   :  { %s1244_s22 = scalar_lea.vmem %s22_s27, 32  ;;  %p1249_p12 = scmp.lt.s32.totalorder %s22_s27, %s22_s27 }
  0x1a   :  { %p1245_p11 = scmp.ne.s32.totalorder %s22_s27, %s1244_s22  ;;  %p1250_p13 = scmp.lt.s32.totalorder %s1244_s22, %s1244_s22 }
  0x1c   :  { %p1251_p0 = por %p1250_p13, %p1249_p12 }
  0x1e   :  { %p1252_p1 = pnand %p1251_p0, %p1245_p11 }
  0x20   :  { %1255 = shalt.err (!%p1252_p1)
}
  0x21   :  { %24 = dma.hbm_to_vmem [thread:$0]  %s1444_s0, 32, %s22_s27, [#allocation3]  }
  0x22   :  { %s1308_s24 = smov [#allocation6]   ;;  %s1256_s29 = scalar_lea.hbm %s1447_s3, 512 }
  0x23   :  { %s42_s25 = sshll.u32 %s1308_s24, 4  ;;  %p1257_p2 = scmp.ne.s32.totalorder %s1447_s3, %s1256_s29  ;;  %s43_s25 = int_to_ptr.vmem [resolvable:$true] %s42_s25 }
  0x24   :  { %p1260_p3 = scmp.lt.u32.totalorder %s1256_s29, %s1447_s3 }
  0x26   :  { %p1262_p4 = pnand %p1260_p3, %p1257_p2 }
  0x28   :  { %1265 = shalt.err (!%p1262_p4)
}
  0x29   :  { %s1266_s11 = scalar_lea.vmem %s43_s25, 512  ;;  %p1271_p6 = scmp.lt.s32.totalorder %s43_s25, %s43_s25 }
  0x2a   :  { %p1267_p5 = scmp.ne.s32.totalorder %s43_s25, %s1266_s11  ;;  %p1272_p7 = scmp.lt.s32.totalorder %s1266_s11, %s1266_s11 }
  0x2c   :  { %p1273_p8 = por %p1272_p7, %p1271_p6 }
  0x2e   :  { %p1274_p9 = pnand %p1273_p8, %p1267_p5 }
  0x30   :  { %1277 = shalt.err (!%p1274_p9)
}
  0x31   :  { %s1309_s0 = smov 256   ;;  %s1310_s27 = smov 16  }
  0x32   :  { %48 = dma.hbm_to_vmem [thread:$0]  %s1447_s3, 512, %s43_s25, [#allocation5], %s1309_s0, %s1309_s0, %s1310_s27  }
  0x33   :  { %s1311_s14 = smov [#allocation7]   ;;  %s1278_s18 = scalar_lea.hbm %s1449_s5, 28672 }
  0x34   :  { %s56_s15 = sshll.u32 %s1311_s14, 4  ;;  %p1279_p10 = scmp.ne.s32.totalorder %s1449_s5, %s1278_s18  ;;  %s57_s15 = int_to_ptr.vmem [resolvable:$true] %s56_s15 }
  0x35   :  { %p1282_p11 = scmp.lt.u32.totalorder %s1278_s18, %s1449_s5 }
  0x37   :  { %p1284_p12 = pnand %p1282_p11, %p1279_p10 }
  0x39   :  { %1287 = shalt.err (!%p1284_p12)
}
  0x3a   :  { %s1288_s2 = scalar_lea.vmem %s57_s15, 28672  ;;  %p1293_p0 = scmp.lt.s32.totalorder %s57_s15, %s57_s15 }
  0x3b   :  { %p1289_p13 = scmp.ne.s32.totalorder %s57_s15, %s1288_s2  ;;  %p1294_p1 = scmp.lt.s32.totalorder %s1288_s2, %s1288_s2 }
  0x3d   :  { %p1295_p2 = por %p1294_p1, %p1293_p0 }
  0x3f   :  { %p1296_p3 = pnand %p1295_p2, %p1289_p13 }
  0x41   :  { %1299 = shalt.err (!%p1296_p3)
}
  0x42   :  { %s1312_s3 = smov 896   ;;  %s1313_s23 = smov 56  }
  0x43   :  { %62 = dma.hbm_to_vmem [thread:$0]  %s1449_s5, 28672, %s57_s15, [#allocation8], %s1312_s3, %s1312_s3, %s1313_s23  }
  0x44   :  { %1300 = dma.done.wait [#allocation3], 32  }
  0x45   :  { %1301 = vsyncadd [#allocation3], 4294967264 }
  0x46   :  { %1302 = dma.done.wait [#allocation5], 768  }
  0x47   :  { %1303 = vsyncadd [#allocation5], 4294966528 }
  0x48   :  { %1304 = dma.done.wait [#allocation8], 28672  }
  0x49   :  { %1305 = vsyncadd [#allocation8], 4294938624  ;;  %v1314_v0 = vmov 0.0   ;;  %vm89_vm0 = vcmask 1041408   ;;  %vm1315_vm1 = vmmov 1   ;;  %v82_v1 = vld [vmem:[#allocation6 + $0x8] sm:$0xff] }
  0x4a   :  { %160 = vmatprep.mubr.f32.mxu0 %v1314_v0  ;;  %vm942_vm2 = vmpackc.low %vm89_vm0, %vm1315_vm1  ;;  %v84_v2 = vld [vmem:[#allocation6 + $0x18] sm:$0x3]  ;;  %v81_v3 = vld [vmem:[#allocation6] sm:$0xff]  ;;  %vm85_vm3 = vcmask 80896   ;;  %vm167_vm4 = vcmask 64512  }
  0x4b   :  { %v941_v4 = vpack.c.bf16 %v84_v2, %v82_v1  ;;  %v83_v5 = vld [vmem:[#allocation6 + $0x10] sm:$0x3]  ;;  %v79_v7 = vld [vmem:[#allocation4 + $0x8] sm:$0xff]  ;;  %v259_v8 = vld [vmem:[#allocation7 + $0x8] sm:$0xff] }
  0x4c   :  { %v944_v6 = vpack.c.bf16 %v83_v5, %v81_v3  ;;  %v266_v9 = vld [vmem:[#allocation7 + $0x40] sm:$0xff]  ;;  %v261_v10 = vld [vmem:[#allocation7 + $0x18] sm:$0xff]  ;;  %v268_v11 = vld [vmem:[#allocation7 + $0x50] sm:$0xff] }
  0x4d   :  { %943 = vmatprep.subr.msk.bf16.mxu0 %vm942_vm2, %v941_v4  ;;  %v80_v12 = vld [vmem:[%s1445_s1] sm:$0x3]  ;;  %v947_v13 = vpack.c.bf16 %v266_v9, %v259_v8  ;;  %v265_v15 = vld [vmem:[#allocation7 + $0x38] sm:$0xff]  ;;  %v78_v16 = vld [vmem:[#allocation4] sm:$0xff]  ;;  %v1011_v17 = vpack.c.bf16 %v268_v11, %v261_v10 }
  0x4e   :  { %946 = vmatpush1.bf16.msk.msra.mxu0 %vm942_vm2, %v944_v6  ;;  %v258_v14 = vld [vmem:[#allocation7] sm:$0xff]  ;;  %v273_v19 = vld [vmem:[#allocation7 + $0x78] sm:$0xff]  ;;  %v280_v20 = vld [vmem:[#allocation7 + $0xb0] sm:$0xff] }
  0x4f   :  { %171 = vmatprep.subr.mxu0 %v79_v7  ;;  %v949_v18 = vpack.c.bf16 %v265_v15, %v258_v14  ;;  %948 = vmatprep.subr.bf16.mxu1 %v947_v13  ;;  %v951_v21 = vpack.c.bf16 %v280_v20, %v273_v19  ;;  %v272_v22 = vld [vmem:[#allocation7 + $0x70] sm:$0xff]  ;;  %v279_v23 = vld [vmem:[#allocation7 + $0xa8] sm:$0xff]  ;;  %v294_v27 = vld [vmem:[#allocation7 + $0x120] sm:$0xff] }
  0x50   :  { %v260_v24 = vld [vmem:[#allocation7 + $0x10] sm:$0xff]  ;;  %v953_v25 = vpack.c.bf16 %v279_v23, %v272_v22  ;;  %v287_v26 = vld [vmem:[#allocation7 + $0xe8] sm:$0xff]  ;;  %v286_v30 = vld [vmem:[#allocation7 + $0xe0] sm:$0xff] }
  0x51   :  { %897 = vmatmul.mubr.msk.f32.vlgmr.msra.gmra.mrb[0].mxu0 %vm85_vm3, %v80_v12  ;;  %950 = vmatpush1.bf16.msra.mxu1 %v949_v18  ;;  %v267_v28 = vld [vmem:[#allocation7 + $0x48] sm:$0xff]  ;;  %v955_v29 = vpack.c.bf16 %v294_v27, %v287_v26  ;;  %v293_v31 = vld [vmem:[#allocation7 + $0x118] sm:$0xff]  ;;  %v282_v33 = vld [vmem:[#allocation7 + $0xc0] sm:$0xff] }
  0x52   :  { %172 = vmatpush1.msra.mxu0 %v78_v16  ;;  %235 = vmatprep.mubr.f32.mxu0 %v1314_v0  ;;  %v275_v32 = vld [vmem:[#allocation7 + $0x88] sm:$0xff]  ;;  %v301_v34 = vld [vmem:[#allocation7 + $0x158] sm:$0xff]  ;;  %v957_v36 = vpack.c.bf16 %v293_v31, %v286_v30  ;;  %v308_v37 = vld [vmem:[#allocation7 + $0x190] sm:$0xff]  ;;  %v1013_v38 = vpack.c.bf16 %v267_v28, %v260_v24 }
  0x53   :  { %1012 = vmatprep.subr.bf16.mxu0 %v1011_v17  ;;  %952 = vmatprep.subr.bf16.mxu1 %v951_v21  ;;  %v77_v35 = vld [vmem:[#allocation2] sm:$0x3]  ;;  %v274_v39 = vld [vmem:[#allocation7 + $0x80] sm:$0xff]  ;;  %v959_v40 = vpack.c.bf16 %v308_v37, %v301_v34  ;;  %v300_v41 = vld [vmem:[#allocation7 + $0x150] sm:$0xff]  ;;  %v1015_v43 = vpack.c.bf16 %v282_v33, %v275_v32 }
  0x54   :  { %v307_v42 = vld [vmem:[#allocation7 + $0x188] sm:$0xff]  ;;  %v281_v44 = vld [vmem:[#allocation7 + $0xb8] sm:$0xff]  ;;  %v322_v46 = vld [vmem:[#allocation7 + $0x200] sm:$0xff] }
  0x55   :  { %954 = vmatpush1.bf16.msra.mxu1 %v953_v25  ;;  %v315_v45 = vld [vmem:[#allocation7 + $0x1c8] sm:$0xff]  ;;  %v289_v47 = vld [vmem:[#allocation7 + $0xf8] sm:$0xff]  ;;  %v296_v48 = vld [vmem:[#allocation7 + $0x130] sm:$0xff]  ;;  %v961_v49 = vpack.c.bf16 %v307_v42, %v300_v41  ;;  %v1017_v50 = vpack.c.bf16 %v281_v44, %v274_v39 }
  0x56   :  { %956 = vmatprep.subr.bf16.mxu1 %v955_v29  ;;  %v288_v51 = vld [vmem:[#allocation7 + $0xf0] sm:$0xff]  ;;  %v963_v52 = vpack.c.bf16 %v322_v46, %v315_v45  ;;  %v314_v53 = vld [vmem:[#allocation7 + $0x1c0] sm:$0xff]  ;;  %v321_v54 = vld [vmem:[#allocation7 + $0x1f8] sm:$0xff]  ;;  %v1019_v55 = vpack.c.bf16 %v296_v48, %v289_v47 }
  0x57   :  { %v295_v56 = vld [vmem:[#allocation7 + $0x128] sm:$0xff]  ;;  %v329_v57 = vld [vmem:[#allocation7 + $0x238] sm:$0xff]  ;;  %v336_v58 = vld [vmem:[#allocation7 + $0x270] sm:$0xff]  ;;  %v965_v61 = vpack.c.bf16 %v321_v54, %v314_v53 }
  0x58   :  { %v303_v59 = vld [vmem:[#allocation7 + $0x168] sm:$0xff]  ;;  %v310_v60 = vld [vmem:[#allocation7 + $0x1a0] sm:$0xff]  ;;  %v1021_v62 = vpack.c.bf16 %v295_v56, %v288_v51  ;;  %v967_v0 = vpack.c.bf16 %v336_v58, %v329_v57  ;;  %v328_v1 = vld [vmem:[#allocation7 + $0x230] sm:$0xff] }
  0x59   :  { %898 = vmatmul.mubr.msk.f32.vlgmr.msra.gmra.mrb[0].mxu0 %vm167_vm4, %v77_v35  ;;  %958 = vmatpush1.bf16.msra.mxu1 %v957_v36  ;;  %v302_v63 = vld [vmem:[#allocation7 + $0x160] sm:$0xff]  ;;  %v335_v2 = vld [vmem:[#allocation7 + $0x268] sm:$0xff]  ;;  %v1023_v3 = vpack.c.bf16 %v310_v60, %v303_v59  ;;  %v309_v4 = vld [vmem:[#allocation7 + $0x198] sm:$0xff] }
  0x5a   :  { %1014 = vmatpush1.bf16.msra.mxu0 %v1013_v38  ;;  %960 = vmatprep.subr.bf16.mxu1 %v959_v40  ;;  %v343_v5 = vld [vmem:[#allocation7 + $0x2a8] sm:$0xff]  ;;  %v350_v6 = vld [vmem:[#allocation7 + $0x2e0] sm:$0xff]  ;;  %v317_v7 = vld [vmem:[#allocation7 + $0x1d8] sm:$0xff]  ;;  %v969_v9 = vpack.c.bf16 %v335_v2, %v328_v1  ;;  %v1025_v10 = vpack.c.bf16 %v309_v4, %v302_v63 }
  0x5b   :  { %1016 = vmatprep.subr.bf16.mxu0 %v1015_v43  ;;  %v324_v8 = vld [vmem:[#allocation7 + $0x210] sm:$0xff]  ;;  %v971_v12 = vpack.c.bf16 %v350_v6, %v343_v5  ;;  %v342_v13 = vld [vmem:[#allocation7 + $0x2a0] sm:$0xff]  ;;  %v349_v14 = vld [vmem:[#allocation7 + $0x2d8] sm:$0xff] }
  0x5c   :  { %v316_v11 = vld [vmem:[#allocation7 + $0x1d0] sm:$0xff]  ;;  %v1027_v15 = vpack.c.bf16 %v324_v8, %v317_v7  ;;  %v323_v16 = vld [vmem:[#allocation7 + $0x208] sm:$0xff]  ;;  %v357_v17 = vld [vmem:[#allocation7 + $0x318] sm:$0xff]  ;;  %v973_v21 = vpack.c.bf16 %v349_v14, %v342_v13 }
  0x5d   :  { %962 = vmatpush1.bf16.msra.mxu1 %v961_v49  ;;  %v364_v18 = vld [vmem:[#allocation7 + $0x350] sm:$0xff]  ;;  %v331_v19 = vld [vmem:[#allocation7 + $0x248] sm:$0xff]  ;;  %v338_v20 = vld [vmem:[#allocation7 + $0x280] sm:$0xff]  ;;  %v1029_v22 = vpack.c.bf16 %v323_v16, %v316_v11 }
  0x5e   :  { %1018 = vmatpush1.bf16.msra.mxu0 %v1017_v50  ;;  %964 = vmatprep.subr.bf16.mxu1 %v963_v52  ;;  %v330_v23 = vld [vmem:[#allocation7 + $0x240] sm:$0xff]  ;;  %v975_v24 = vpack.c.bf16 %v364_v18, %v357_v17  ;;  %v356_v25 = vld [vmem:[#allocation7 + $0x310] sm:$0xff]  ;;  %v363_v26 = vld [vmem:[#allocation7 + $0x348] sm:$0xff]  ;;  %v1031_v27 = vpack.c.bf16 %v338_v20, %v331_v19 }
  0x5f   :  { %1020 = vmatprep.subr.bf16.mxu0 %v1019_v55  ;;  %v337_v28 = vld [vmem:[#allocation7 + $0x278] sm:$0xff]  ;;  %v371_v29 = vld [vmem:[#allocation7 + $0x388] sm:$0xff]  ;;  %v378_v30 = vld [vmem:[#allocation7 + $0x3c0] sm:$0xff]  ;;  %v977_v33 = vpack.c.bf16 %v363_v26, %v356_v25 }
  0x60   :  { %v345_v31 = vld [vmem:[#allocation7 + $0x2b8] sm:$0xff]  ;;  %v352_v32 = vld [vmem:[#allocation7 + $0x2f0] sm:$0xff]  ;;  %v1033_v34 = vpack.c.bf16 %v337_v28, %v330_v23  ;;  %v979_v36 = vpack.c.bf16 %v378_v30, %v371_v29  ;;  %v370_v37 = vld [vmem:[#allocation7 + $0x380] sm:$0xff] }
  0x61   :  { %966 = vmatpush1.bf16.msra.mxu1 %v965_v61  ;;  %v344_v35 = vld [vmem:[#allocation7 + $0x2b0] sm:$0xff]  ;;  %v377_v38 = vld [vmem:[#allocation7 + $0x3b8] sm:$0xff]  ;;  %v1035_v39 = vpack.c.bf16 %v352_v32, %v345_v31  ;;  %v351_v40 = vld [vmem:[#allocation7 + $0x2e8] sm:$0xff] }
  0x62   :  { %1022 = vmatpush1.bf16.msra.mxu0 %v1021_v62  ;;  %968 = vmatprep.subr.bf16.mxu1 %v967_v0  ;;  %v385_v41 = vld [vmem:[#allocation7 + $0x3f8] sm:$0xff]  ;;  %v392_v42 = vld [vmem:[#allocation7 + $0x430] sm:$0xff]  ;;  %v359_v43 = vld [vmem:[#allocation7 + $0x328] sm:$0xff]  ;;  %v981_v45 = vpack.c.bf16 %v377_v38, %v370_v37  ;;  %v1037_v46 = vpack.c.bf16 %v351_v40, %v344_v35 }
  0x63   :  { %1024 = vmatprep.subr.bf16.mxu0 %v1023_v3  ;;  %v366_v44 = vld [vmem:[#allocation7 + $0x360] sm:$0xff]  ;;  %v983_v48 = vpack.c.bf16 %v392_v42, %v385_v41  ;;  %v384_v49 = vld [vmem:[#allocation7 + $0x3f0] sm:$0xff]  ;;  %v391_v50 = vld [vmem:[#allocation7 + $0x428] sm:$0xff] }
  0x64   :  { %v358_v47 = vld [vmem:[#allocation7 + $0x320] sm:$0xff]  ;;  %v1039_v51 = vpack.c.bf16 %v366_v44, %v359_v43  ;;  %v365_v52 = vld [vmem:[#allocation7 + $0x358] sm:$0xff]  ;;  %v399_v53 = vld [vmem:[#allocation7 + $0x468] sm:$0xff]  ;;  %v985_v57 = vpack.c.bf16 %v391_v50, %v384_v49 }
  0x65   :  { %970 = vmatpush1.bf16.msra.mxu1 %v969_v9  ;;  %v406_v54 = vld [vmem:[#allocation7 + $0x4a0] sm:$0xff]  ;;  %v373_v55 = vld [vmem:[#allocation7 + $0x398] sm:$0xff]  ;;  %v380_v56 = vld [vmem:[#allocation7 + $0x3d0] sm:$0xff]  ;;  %v1041_v58 = vpack.c.bf16 %v365_v52, %v358_v47 }
  0x66   :  { %1026 = vmatpush1.bf16.msra.mxu0 %v1025_v10  ;;  %972 = vmatprep.subr.bf16.mxu1 %v971_v12  ;;  %v372_v59 = vld [vmem:[#allocation7 + $0x390] sm:$0xff]  ;;  %v987_v60 = vpack.c.bf16 %v406_v54, %v399_v53  ;;  %v398_v61 = vld [vmem:[#allocation7 + $0x460] sm:$0xff]  ;;  %v405_v62 = vld [vmem:[#allocation7 + $0x498] sm:$0xff]  ;;  %v1043_v63 = vpack.c.bf16 %v380_v56, %v373_v55 }
  0x67   :  { %1028 = vmatprep.subr.bf16.mxu0 %v1027_v15  ;;  %v379_v0 = vld [vmem:[#allocation7 + $0x3c8] sm:$0xff]  ;;  %v413_v1 = vld [vmem:[#allocation7 + $0x4d8] sm:$0xff]  ;;  %v420_v2 = vld [vmem:[#allocation7 + $0x510] sm:$0xff]  ;;  %v989_v5 = vpack.c.bf16 %v405_v62, %v398_v61 }
  0x68   :  { %v387_v3 = vld [vmem:[#allocation7 + $0x408] sm:$0xff]  ;;  %v394_v4 = vld [vmem:[#allocation7 + $0x440] sm:$0xff]  ;;  %v1045_v6 = vpack.c.bf16 %v379_v0, %v372_v59  ;;  %v991_v8 = vpack.c.bf16 %v420_v2, %v413_v1  ;;  %v412_v9 = vld [vmem:[#allocation7 + $0x4d0] sm:$0xff] }
  0x69   :  { %974 = vmatpush1.bf16.msra.mxu1 %v973_v21  ;;  %v386_v7 = vld [vmem:[#allocation7 + $0x400] sm:$0xff]  ;;  %v419_v10 = vld [vmem:[#allocation7 + $0x508] sm:$0xff]  ;;  %v1047_v11 = vpack.c.bf16 %v394_v4, %v387_v3  ;;  %v393_v12 = vld [vmem:[#allocation7 + $0x438] sm:$0xff] }
  0x6a   :  { %1030 = vmatpush1.bf16.msra.mxu0 %v1029_v22  ;;  %976 = vmatprep.subr.bf16.mxu1 %v975_v24  ;;  %v427_v13 = vld [vmem:[#allocation7 + $0x548] sm:$0xff]  ;;  %v434_v14 = vld [vmem:[#allocation7 + $0x580] sm:$0xff]  ;;  %v401_v15 = vld [vmem:[#allocation7 + $0x478] sm:$0xff]  ;;  %v993_v17 = vpack.c.bf16 %v419_v10, %v412_v9  ;;  %v1049_v18 = vpack.c.bf16 %v393_v12, %v386_v7 }
  0x6b   :  { %1032 = vmatprep.subr.bf16.mxu0 %v1031_v27  ;;  %v408_v16 = vld [vmem:[#allocation7 + $0x4b0] sm:$0xff]  ;;  %v995_v20 = vpack.c.bf16 %v434_v14, %v427_v13  ;;  %v426_v21 = vld [vmem:[#allocation7 + $0x540] sm:$0xff]  ;;  %v433_v22 = vld [vmem:[#allocation7 + $0x578] sm:$0xff] }
  0x6c   :  { %v400_v19 = vld [vmem:[#allocation7 + $0x470] sm:$0xff]  ;;  %v1051_v23 = vpack.c.bf16 %v408_v16, %v401_v15  ;;  %v407_v24 = vld [vmem:[#allocation7 + $0x4a8] sm:$0xff]  ;;  %v441_v25 = vld [vmem:[#allocation7 + $0x5b8] sm:$0xff]  ;;  %v997_v29 = vpack.c.bf16 %v433_v22, %v426_v21 }
  0x6d   :  { %978 = vmatpush1.bf16.msra.mxu1 %v977_v33  ;;  %v448_v26 = vld [vmem:[#allocation7 + $0x5f0] sm:$0xff]  ;;  %v415_v27 = vld [vmem:[#allocation7 + $0x4e8] sm:$0xff]  ;;  %v422_v28 = vld [vmem:[#allocation7 + $0x520] sm:$0xff]  ;;  %v1053_v30 = vpack.c.bf16 %v407_v24, %v400_v19 }
  0x6e   :  { %1034 = vmatpush1.bf16.msra.mxu0 %v1033_v34  ;;  %980 = vmatprep.subr.bf16.mxu1 %v979_v36  ;;  %v414_v31 = vld [vmem:[#allocation7 + $0x4e0] sm:$0xff]  ;;  %v999_v32 = vpack.c.bf16 %v448_v26, %v441_v25  ;;  %v440_v33 = vld [vmem:[#allocation7 + $0x5b0] sm:$0xff]  ;;  %v447_v34 = vld [vmem:[#allocation7 + $0x5e8] sm:$0xff]  ;;  %v1055_v35 = vpack.c.bf16 %v422_v28, %v415_v27 }
  0x6f   :  { %1036 = vmatprep.subr.bf16.mxu0 %v1035_v39  ;;  %v421_v36 = vld [vmem:[#allocation7 + $0x518] sm:$0xff]  ;;  %v455_v37 = vld [vmem:[#allocation7 + $0x628] sm:$0xff]  ;;  %v462_v38 = vld [vmem:[#allocation7 + $0x660] sm:$0xff]  ;;  %v1001_v41 = vpack.c.bf16 %v447_v34, %v440_v33 }
  0x70   :  { %v429_v39 = vld [vmem:[#allocation7 + $0x558] sm:$0xff]  ;;  %v436_v40 = vld [vmem:[#allocation7 + $0x590] sm:$0xff]  ;;  %v1057_v42 = vpack.c.bf16 %v421_v36, %v414_v31  ;;  %v1003_v43 = vpack.c.bf16 %v462_v38, %v455_v37  ;;  %v454_v44 = vld [vmem:[#allocation7 + $0x620] sm:$0xff] }
  0x71   :  { %982 = vmatpush1.bf16.msra.mxu1 %v981_v45  ;;  %v461_v45 = vld [vmem:[#allocation7 + $0x658] sm:$0xff]  ;;  %v428_v47 = vld [vmem:[#allocation7 + $0x550] sm:$0xff]  ;;  %v443_v49 = vld [vmem:[#allocation7 + $0x5c8] sm:$0xff] }
  0x72   :  { %1038 = vmatpush1.bf16.msra.mxu0 %v1037_v46  ;;  %984 = vmatprep.subr.bf16.mxu1 %v983_v48  ;;  %v1059_v46 = vpack.c.bf16 %v436_v40, %v429_v39  ;;  %v435_v48 = vld [vmem:[#allocation7 + $0x588] sm:$0xff]  ;;  %v450_v50 = vld [vmem:[#allocation7 + $0x600] sm:$0xff]  ;;  %v449_v55 = vld [vmem:[#allocation7 + $0x5f8] sm:$0xff] }
  0x73   :  { %1040 = vmatprep.subr.bf16.mxu0 %v1039_v51  ;;  %v1005_v51 = vpack.c.bf16 %v461_v45, %v454_v44  ;;  %v1061_v52 = vpack.c.bf16 %v435_v48, %v428_v47  ;;  %v1063_v53 = vpack.c.bf16 %v450_v50, %v443_v49  ;;  %v442_v54 = vld [vmem:[#allocation7 + $0x5c0] sm:$0xff]  ;;  %v457_v56 = vld [vmem:[#allocation7 + $0x638] sm:$0xff]  ;;  %v463_v61 = vld [vmem:[#allocation7 + $0x668] sm:$0xff] }
  0x74   :  { %v476_v0 = vld [vmem:[#allocation7 + $0x6d0] sm:$0xff]  ;;  %v471_v1 = vld [vmem:[#allocation7 + $0x6a8] sm:$0xff]  ;;  %v478_v3 = vld [vmem:[#allocation7 + $0x6e0] sm:$0xff] }
  0x75   :  { %986 = vmatpush1.bf16.msra.mxu1 %v985_v57  ;;  %v464_v57 = vld [vmem:[#allocation7 + $0x670] sm:$0xff]  ;;  %v477_v9 = vld [vmem:[#allocation7 + $0x6d8] sm:$0xff]  ;;  %v270_v12 = vld [vmem:[#allocation7 + $0x60] sm:$0xff] }
  0x76   :  { %1042 = vmatpush1.bf16.msra.mxu0 %v1041_v58  ;;  %988 = vmatprep.subr.bf16.mxu1 %v987_v60  ;;  %v1065_v58 = vpack.c.bf16 %v449_v55, %v442_v54  ;;  %v1067_v59 = vpack.c.bf16 %v464_v57, %v457_v56  ;;  %v456_v60 = vld [vmem:[#allocation7 + $0x630] sm:$0xff]  ;;  %v383_v15 = vld [vmem:[#allocation7 + $0x3e8] sm:$0xff]  ;;  %v262_v25 = vld [vmem:[#allocation7 + $0x20] sm:$0xff] }
  0x77   :  { %1044 = vmatprep.subr.bf16.mxu0 %v1043_v63  ;;  %v1069_v62 = vpack.c.bf16 %v463_v61, %v456_v60  ;;  %v469_v63 = vld [vmem:[#allocation7 + $0x698] sm:$0xff]  ;;  %v468_v4 = vld [vmem:[#allocation7 + $0x690] sm:$0xff]  ;;  %v390_v34 = vld [vmem:[#allocation7 + $0x420] sm:$0xff] }
  0x78   :  { %v1007_v2 = vpack.c.bf16 %v476_v0, %v469_v63  ;;  %v376_v13 = vld [vmem:[#allocation7 + $0x3b0] sm:$0xff]  ;;  %v269_v28 = vld [vmem:[#allocation7 + $0x58] sm:$0xff]  ;;  %v283_v40 = vld [vmem:[#allocation7 + $0xc8] sm:$0xff] }
  0x79   :  { %990 = vmatpush1.bf16.msra.mxu1 %v989_v5  ;;  %v475_v5 = vld [vmem:[#allocation7 + $0x6c8] sm:$0xff]  ;;  %v1139_v16 = vpack.c.bf16 %v383_v15, %v376_v13  ;;  %v284_v33 = vld [vmem:[#allocation7 + $0xd0] sm:$0xff]  ;;  %v1077_v37 = vpack.c.bf16 %v269_v28, %v262_v25  ;;  %v298_v47 = vld [vmem:[#allocation7 + $0x140] sm:$0xff] }
  0x7a   :  { %1046 = vmatpush1.bf16.msra.mxu0 %v1045_v6  ;;  %992 = vmatprep.subr.bf16.mxu1 %v991_v8  ;;  %v1071_v6 = vpack.c.bf16 %v478_v3, %v471_v1  ;;  %v1009_v7 = vpack.c.bf16 %v475_v5, %v468_v4  ;;  %v470_v8 = vld [vmem:[#allocation7 + $0x6a0] sm:$0xff]  ;;  %v276_v39 = vld [vmem:[#allocation7 + $0x90] sm:$0xff]  ;;  %v291_v44 = vld [vmem:[#allocation7 + $0x108] sm:$0xff] }
  0x7b   :  { %1048 = vmatprep.subr.bf16.mxu0 %v1047_v11  ;;  %v1073_v10 = vpack.c.bf16 %v477_v9, %v470_v8  ;;  %v263_v11 = vld [vmem:[#allocation7 + $0x28] sm:$0xff]  ;;  %v404_v48 = vld [vmem:[#allocation7 + $0x490] sm:$0xff]  ;;  %v1081_v50 = vpack.c.bf16 %v283_v40, %v276_v39  ;;  %v1083_v54 = vpack.c.bf16 %v298_v47, %v291_v44  ;;  %v418_v60 = vld [vmem:[#allocation7 + $0x500] sm:$0xff] }
  0x7c   :  { %v1075_v14 = vpack.c.bf16 %v270_v12, %v263_v11  ;;  %v411_v49 = vld [vmem:[#allocation7 + $0x4c8] sm:$0xff]  ;;  %v292_v56 = vld [vmem:[#allocation7 + $0x110] sm:$0xff]  ;;  %v425_v61 = vld [vmem:[#allocation7 + $0x538] sm:$0xff] }
  0x7d   :  { %994 = vmatpush1.bf16.msra.mxu1 %v993_v17  ;;  %v244_v17 = vlaneseq  ;;  %v1147_v55 = vpack.c.bf16 %v411_v49, %v404_v48  ;;  %v299_v57 = vld [vmem:[#allocation7 + $0x148] sm:$0xff]  ;;  %v304_v0 = vld [vmem:[#allocation7 + $0x170] sm:$0xff]  ;;  %v1151_v3 = vpack.c.bf16 %v425_v61, %v418_v60  ;;  %v306_v4 = vld [vmem:[#allocation7 + $0x180] sm:$0xff] }
  0x7e   :  { %1050 = vmatpush1.bf16.msra.mxu0 %v1049_v18  ;;  %996 = vmatprep.subr.bf16.mxu1 %v995_v20  ;;  %v242_v20 = vld [vmem:[%s1448_s4] sm:$0x3]  ;;  %v1149_v63 = vpack.c.bf16 %v299_v57, %v292_v56  ;;  %v311_v1 = vld [vmem:[#allocation7 + $0x1a8] sm:$0xff]  ;;  %v313_v5 = vld [vmem:[#allocation7 + $0x1b8] sm:$0xff] }
  0x7f   :  { %1052 = vmatprep.subr.bf16.mxu0 %v1051_v23  ;;  %v1408_v18 = vshrl.u32 %v244_v17, 7  ;;  %v432_v8 = vld [vmem:[#allocation7 + $0x570] sm:$0xff]  ;;  %v439_v9 = vld [vmem:[#allocation7 + $0x5a8] sm:$0xff]  ;;  %v1153_v11 = vpack.c.bf16 %v313_v5, %v306_v4  ;;  %v318_v12 = vld [vmem:[#allocation7 + $0x1e0] sm:$0xff] }
  0x80   :  { %v325_v13 = vld [vmem:[#allocation7 + $0x218] sm:$0xff]  ;;  %v1155_v15 = vpack.c.bf16 %v439_v9, %v432_v8  ;;  %v327_v17 = vld [vmem:[#allocation7 + $0x228] sm:$0xff]  ;;  %v346_v39 = vld [vmem:[#allocation7 + $0x2c0] sm:$0xff] }
  0x81   :  { %998 = vmatpush1.bf16.msra.mxu1 %v997_v29  ;;  %v246_v19 = vsub.s32 0, %v1408_v18  ;;  %v250_v21 = vsub.s32 1, %v1408_v18  ;;  %v264_v29 = vld [vmem:[#allocation7 + $0x30] sm:$0xff]  ;;  %v1093_v25 = vpack.c.bf16 %v325_v13, %v318_v12  ;;  %v339_v28 = vld [vmem:[#allocation7 + $0x288] sm:$0xff]  ;;  %v353_v40 = vld [vmem:[#allocation7 + $0x2f8] sm:$0xff] }
  0x82   :  { %1054 = vmatpush1.bf16.msra.mxu0 %v1053_v30  ;;  %1000 = vmatprep.subr.bf16.mxu1 %v999_v32  ;;  %v271_v30 = vld [vmem:[#allocation7 + $0x68] sm:$0xff]  ;;  %v277_v32 = vld [vmem:[#allocation7 + $0x98] sm:$0xff]  ;;  %v348_v44 = vld [vmem:[#allocation7 + $0x2d0] sm:$0xff] }
  0x83   :  { %1056 = vmatprep.subr.bf16.mxu0 %v1055_v35  ;;  %v247_v22 = vrot.slane %v242_v20, %v246_v19  ;;  %v251_v23 = vrot.slane %v242_v20, %v250_v21  ;;  %v397_v35 = vld [vmem:[#allocation7 + $0x458] sm:$0xff]  ;;  %v1141_v38 = vpack.c.bf16 %v271_v30, %v264_v29  ;;  %v1079_v45 = vpack.c.bf16 %v284_v33, %v277_v32  ;;  %v347_v33 = vld [vmem:[#allocation7 + $0x2c8] sm:$0xff]  ;;  %v368_v47 = vld [vmem:[#allocation7 + $0x370] sm:$0xff] }
  0x84   :  { %v333_v20 = vld [vmem:[#allocation7 + $0x258] sm:$0xff]  ;;  %v474_v48 = vld [vmem:[#allocation7 + $0x6c0] sm:$0xff]  ;;  %v388_v5 = vld [vmem:[#allocation7 + $0x410] sm:$0xff] }
  0x85   :  { %1002 = vmatpush1.bf16.msra.mxu1 %v1001_v41  ;;  %v341_v32 = vld [vmem:[#allocation7 + $0x298] sm:$0xff]  ;;  %v362_v56 = vld [vmem:[#allocation7 + $0x340] sm:$0xff] }
  0x86   :  { %1058 = vmatpush1.bf16.msra.mxu0 %v1057_v42  ;;  %1004 = vmatprep.subr.bf16.mxu1 %v1003_v43  ;;  %v278_v42 = vld [vmem:[#allocation7 + $0xa0] sm:$0xff]  ;;  %v285_v43 = vld [vmem:[#allocation7 + $0xd8] sm:$0xff] }
  0x87   :  { %1060 = vmatprep.subr.bf16.mxu0 %v1059_v46  ;;  %v1143_v46 = vpack.c.bf16 %v397_v35, %v390_v34  ;;  %v354_v34 = vld [vmem:[#allocation7 + $0x300] sm:$0xff]  ;;  %v460_v35 = vld [vmem:[#allocation7 + $0x650] sm:$0xff]  ;;  %v481_v49 = vld [vmem:[#allocation7 + $0x6f8] sm:$0xff] }
  0x88   :  { %v369_v57 = vld [vmem:[#allocation7 + $0x378] sm:$0xff]  ;;  %v410_v8 = vld [vmem:[#allocation7 + $0x4c0] sm:$0xff] }
  0x89   :  { %1006 = vmatpush1.bf16.msra.mxu1 %v1005_v51  ;;  %v1145_v51 = vpack.c.bf16 %v285_v43, %v278_v42  ;;  %v1099_v42 = vpack.c.bf16 %v354_v34, %v347_v33  ;;  %v1169_v61 = vpack.c.bf16 %v369_v57, %v362_v56  ;;  %v409_v12 = vld [vmem:[#allocation7 + $0x4b8] sm:$0xff]  ;;  %v451_v33 = vld [vmem:[#allocation7 + $0x608] sm:$0xff] }
  0x8a   :  { %1062 = vmatpush1.bf16.msra.mxu0 %v1061_v52  ;;  %1008 = vmatprep.subr.bf16.mxu1 %v1007_v2  ;;  %v290_v52 = vld [vmem:[#allocation7 + $0x100] sm:$0xff]  ;;  %v417_v13 = vld [vmem:[#allocation7 + $0x4f8] sm:$0xff]  ;;  %v459_v34 = vld [vmem:[#allocation7 + $0x648] sm:$0xff] }
  0x8b   :  { %1064 = vmatprep.subr.bf16.mxu0 %v1063_v53  ;;  %v297_v53 = vld [vmem:[#allocation7 + $0x138] sm:$0xff] }
  0x8d   :  { %1010 = vmatpush1.bf16.msra.mxu1 %v1009_v7  ;;  %v326_v7 = vld [vmem:[#allocation7 + $0x220] sm:$0xff] }
  0x8e   :  { %1066 = vmatpush1.bf16.msra.mxu0 %v1065_v58  ;;  %1076 = vmatprep.subr.bf16.mxu1 %v1075_v14  ;;  %v305_v58 = vld [vmem:[#allocation7 + $0x178] sm:$0xff] }
  0x8f   :  { %1068 = vmatprep.subr.bf16.mxu0 %v1067_v59  ;;  %v312_v59 = vld [vmem:[#allocation7 + $0x1b0] sm:$0xff] }
  0x90   :  { %v1087_v2 = vpack.c.bf16 %v312_v59, %v305_v58  ;;  %v375_v58 = vld [vmem:[#allocation7 + $0x3a8] sm:$0xff]  ;;  %v382_v59 = vld [vmem:[#allocation7 + $0x3e0] sm:$0xff] }
  0x92   :  { %1070 = vmatpush1.bf16.msra.mxu0 %v1069_v62  ;;  %v1085_v62 = vpack.c.bf16 %v297_v53, %v290_v52  ;;  %v360_v52 = vld [vmem:[#allocation7 + $0x330] sm:$0xff] }
  0x93   :  { %1072 = vmatprep.subr.bf16.mxu0 %v1071_v6  ;;  %v319_v6 = vld [vmem:[#allocation7 + $0x1e8] sm:$0xff] }
  0x94   :  { %v1091_v14 = vpack.c.bf16 %v326_v7, %v319_v6  ;;  %v395_v6 = vld [vmem:[#allocation7 + $0x448] sm:$0xff] }
  0x95   :  { %v403_v7 = vld [vmem:[#allocation7 + $0x488] sm:$0xff]  ;;  %v1113_v9 = vpack.c.bf16 %v395_v6, %v388_v5 }
  0x96   :  { %1074 = vmatpush1.bf16.msra.mxu0 %v1073_v10  ;;  %v1089_v10 = vpack.c.bf16 %v311_v1, %v304_v0  ;;  %v381_v0 = vld [vmem:[#allocation7 + $0x3d8] sm:$0xff] }
  0x97   :  { %1140 = vmatprep.subr.bf16.mxu0 %v1139_v16  ;;  %v320_v16 = vld [vmem:[#allocation7 + $0x1f0] sm:$0xff]  ;;  %v389_v1 = vld [vmem:[#allocation7 + $0x418] sm:$0xff] }
 0x12c   :  { %v237_v24 = vpop.f32.mrb[0].mxu0 }
 0x12d   :  { %v254_v26 = vadd.f32 %v247_v22, %v237_v24  ;;  %v239_v27 = vpop.f32.mrb[1].mxu0  ;;  %v340_v22 = vld [vmem:[#allocation7 + $0x290] sm:$0xff]  ;;  %v453_v24 = vld [vmem:[#allocation7 + $0x618] sm:$0xff] }
 0x12e   :  { %v255_v31 = vadd.f32 %v251_v23, %v239_v27  ;;  %v446_v23 = vld [vmem:[#allocation7 + $0x5e0] sm:$0xff]  ;;  %v332_v27 = vld [vmem:[#allocation7 + $0x250] sm:$0xff]  ;;  %v1095_v29 = vpack.c.bf16 %v340_v22, %v333_v20  ;;  %v423_v20 = vld [vmem:[#allocation7 + $0x528] sm:$0xff] }
 0x12f   :  { %v1419_v41 = vmax.f32 %v254_v26, 0.0  ;;  %v1157_v26 = vpack.c.bf16 %v327_v17, %v320_v16  ;;  %v1159_v30 = vpack.c.bf16 %v453_v24, %v446_v23  ;;  %v416_v17 = vld [vmem:[#allocation7 + $0x4f0] sm:$0xff]  ;;  %v431_v22 = vld [vmem:[#allocation7 + $0x568] sm:$0xff]  ;;  %v438_v23 = vld [vmem:[#allocation7 + $0x5a0] sm:$0xff] }
 0x130   :  { %v257_v36 = vmax.f32 %v255_v31, 0.0  ;;  %v334_v31 = vld [vmem:[#allocation7 + $0x260] sm:$0xff]  ;;  %v1121_v24 = vpack.c.bf16 %v423_v20, %v416_v17 }
 0x132   :  { %583 = vmatprep.mubr.f32.mxu1 %v257_v36  ;;  %654 = vmatprep.mubr.f32.mxu0 %v257_v36 }
 0x133   :  { %584 = vmatmul.mubr.f32.vlgmr.msra.gmra.mrb[0].mxu1 %v1419_v41  ;;  %655 = vmatmul.mubr.f32.vlgmr.msra.gmra.mrb[2].mxu0 %v1419_v41 }
 0x134   :  { %1078 = vmatpush1.bf16.msra.mxu1 %v1077_v37  ;;  %1142 = vmatpush3.bf16.msra.mxu0 %v1141_v38  ;;  %v1097_v37 = vpack.c.bf16 %v339_v28, %v332_v27  ;;  %v1161_v38 = vpack.c.bf16 %v341_v32, %v334_v31  ;;  %v437_v27 = vld [vmem:[#allocation7 + $0x598] sm:$0xff]  ;;  %v444_v32 = vld [vmem:[#allocation7 + $0x5d0] sm:$0xff] }
 0x135   :  { %725 = vmatprep.mubr.f32.mxu1 %v257_v36  ;;  %796 = vmatprep.mubr.f32.mxu0 %v257_v36  ;;  %v467_v36 = vld [vmem:[#allocation7 + $0x688] sm:$0xff]  ;;  %v445_v28 = vld [vmem:[#allocation7 + $0x5d8] sm:$0xff] }
 0x136   :  { %1080 = vmatprep.subr.bf16.mxu1 %v1079_v45  ;;  %1144 = vmatprep.subr.bf16.mxu0 %v1143_v46  ;;  %v1163_v43 = vpack.c.bf16 %v467_v36, %v460_v35  ;;  %v355_v45 = vld [vmem:[#allocation7 + $0x308] sm:$0xff]  ;;  %v361_v46 = vld [vmem:[#allocation7 + $0x338] sm:$0xff]  ;;  %v466_v35 = vld [vmem:[#allocation7 + $0x680] sm:$0xff]  ;;  %v1129_v36 = vpack.c.bf16 %v451_v33, %v444_v32 }
 0x137   :  { %v1103_v53 = vpack.c.bf16 %v368_v47, %v361_v46  ;;  %v479_v46 = vld [vmem:[#allocation7 + $0x6e8] sm:$0xff] }
 0x138   :  { %1082 = vmatpush1.bf16.msra.mxu1 %v1081_v50  ;;  %1146 = vmatpush3.bf16.msra.mxu0 %v1145_v51  ;;  %v1101_v50 = vpack.c.bf16 %v353_v40, %v346_v39  ;;  %v1165_v51 = vpack.c.bf16 %v355_v45, %v348_v44  ;;  %v465_v39 = vld [vmem:[#allocation7 + $0x678] sm:$0xff]  ;;  %v472_v45 = vld [vmem:[#allocation7 + $0x6b0] sm:$0xff] }
 0x139   :  { %1084 = vmatprep.subr.bf16.mxu1 %v1083_v54  ;;  %1148 = vmatprep.subr.bf16.mxu0 %v1147_v55  ;;  %v1167_v54 = vpack.c.bf16 %v481_v49, %v474_v48  ;;  %v367_v55 = vld [vmem:[#allocation7 + $0x368] sm:$0xff]  ;;  %v473_v40 = vld [vmem:[#allocation7 + $0x6b8] sm:$0xff]  ;;  %v1137_v47 = vpack.c.bf16 %v479_v46, %v472_v45  ;;  %v494_v48 = vsub.s32 2, %v1408_v18 }
 0x13a   :  { %v1105_v60 = vpack.c.bf16 %v367_v55, %v360_v52  ;;  %v482_v49 = vld [vmem:[%s1450_s6] sm:$0xff] }
 0x13b   :  { %v495_v52 = vrot.slane %v482_v49, %v494_v48 }
 0x13c   :  { %1086 = vmatpush1.bf16.msra.mxu1 %v1085_v62  ;;  %1150 = vmatpush3.bf16.msra.mxu0 %v1149_v63  ;;  %v1107_v62 = vpack.c.bf16 %v382_v59, %v375_v58  ;;  %v374_v63 = vld [vmem:[#allocation7 + $0x3a0] sm:$0xff] }
 0x13d   :  { %1088 = vmatprep.subr.bf16.mxu1 %v1087_v2  ;;  %1152 = vmatprep.subr.bf16.mxu0 %v1151_v3  ;;  %v396_v2 = vld [vmem:[#allocation7 + $0x450] sm:$0xff]  ;;  %v1109_v3 = vpack.c.bf16 %v381_v0, %v374_v63 }
 0x13e   :  { %v1111_v4 = vpack.c.bf16 %v396_v2, %v389_v1 }
 0x140   :  { %1090 = vmatpush1.bf16.msra.mxu1 %v1089_v10  ;;  %1154 = vmatpush3.bf16.msra.mxu0 %v1153_v11  ;;  %v1115_v10 = vpack.c.bf16 %v410_v8, %v403_v7  ;;  %v402_v11 = vld [vmem:[#allocation7 + $0x480] sm:$0xff]  ;;  %v1316_v8 = vmov 1983009808  }
 0x141   :  { %1092 = vmatprep.subr.bf16.mxu1 %v1091_v14  ;;  %1156 = vmatprep.subr.bf16.mxu0 %v1155_v15  ;;  %v424_v14 = vld [vmem:[#allocation7 + $0x530] sm:$0xff]  ;;  %v1117_v15 = vpack.c.bf16 %v409_v12, %v402_v11  ;;  %v510_v12 = vsub.s32 6, %v1408_v18 }
 0x142   :  { %v1119_v16 = vpack.c.bf16 %v424_v14, %v417_v13 }
 0x144   :  { %1094 = vmatpush1.bf16.msra.mxu1 %v1093_v25  ;;  %1158 = vmatpush3.bf16.msra.mxu0 %v1157_v26  ;;  %v1123_v25 = vpack.c.bf16 %v438_v23, %v431_v22  ;;  %v430_v26 = vld [vmem:[#allocation7 + $0x560] sm:$0xff]  ;;  %v511_v23 = vrot.slane %v482_v49, %v510_v12 }
 0x145   :  { %1096 = vmatprep.subr.bf16.mxu1 %v1095_v29  ;;  %1160 = vmatprep.subr.bf16.mxu0 %v1159_v30  ;;  %v452_v29 = vld [vmem:[#allocation7 + $0x610] sm:$0xff]  ;;  %v1125_v30 = vpack.c.bf16 %v437_v27, %v430_v26 }
 0x146   :  { %v1127_v31 = vpack.c.bf16 %v452_v29, %v445_v28 }
 0x148   :  { %1098 = vmatpush1.bf16.msra.mxu1 %v1097_v37  ;;  %1162 = vmatpush3.bf16.msra.mxu0 %v1161_v38  ;;  %v1131_v37 = vpack.c.bf16 %v466_v35, %v459_v34  ;;  %v458_v38 = vld [vmem:[#allocation7 + $0x640] sm:$0xff] }
 0x149   :  { %1100 = vmatprep.subr.bf16.mxu1 %v1099_v42  ;;  %1164 = vmatprep.subr.bf16.mxu0 %v1163_v43  ;;  %v480_v42 = vld [vmem:[#allocation7 + $0x6f0] sm:$0xff]  ;;  %v1133_v43 = vpack.c.bf16 %v465_v39, %v458_v38 }
 0x14a   :  { %v1135_v44 = vpack.c.bf16 %v480_v42, %v473_v40 }
 0x14c   :  { %1102 = vmatpush1.bf16.msra.mxu1 %v1101_v50  ;;  %1166 = vmatpush3.bf16.msra.mxu0 %v1165_v51  ;;  %v498_v50 = vsub.s32 3, %v1408_v18  ;;  %v487_v51 = vrot.slane %v482_v49, %v246_v19 }
 0x14d   :  { %1104 = vmatprep.subr.bf16.mxu1 %v1103_v53  ;;  %1168 = vmatprep.subr.bf16.mxu0 %v1167_v54  ;;  %v491_v53 = vrot.slane %v482_v49, %v250_v21 }
 0x14e   :  { %v499_v54 = vrot.slane %v482_v49, %v498_v50 }
 0x150   :  { %1106 = vmatpush1.bf16.msra.mxu1 %v1105_v60  ;;  %1170 = vmatpush3.bf16.msra.mxu0 %v1169_v61 }
 0x151   :  { %1108 = vmatprep.subr.bf16.mxu1 %v1107_v62 }
 0x153   :  { %797 = vmatmul.mubr.f32.vlgmr.msra.gmra.mrb[4].mxu0 %v1419_v41 }
 0x154   :  { %1110 = vmatpush1.bf16.msra.mxu1 %v1109_v3 }
 0x155   :  { %1112 = vmatprep.subr.bf16.mxu1 %v1111_v4 }
 0x158   :  { %1114 = vmatpush1.bf16.msra.mxu1 %v1113_v9  ;;  %v854_v9 = vunpack.c.l.s4 %v1316_v8 }
 0x159   :  { %1116 = vmatprep.subr.bf16.mxu1 %v1115_v10 }
 0x15a   :  { %v855_v10 = vunpack.c.0.s8 %v854_v9 }
 0x15c   :  { %1118 = vmatpush1.bf16.msra.mxu1 %v1117_v15  ;;  %v858_v14 = vsub.s32 %v855_v10, %v1408_v18 }
 0x15d   :  { %1120 = vmatprep.subr.bf16.mxu1 %v1119_v16 }
 0x160   :  { %1122 = vmatpush1.bf16.msra.mxu1 %v1121_v24 }
 0x161   :  { %1124 = vmatprep.subr.bf16.mxu1 %v1123_v25 }
 0x164   :  { %1126 = vmatpush1.bf16.msra.mxu1 %v1125_v30  ;;  %v502_v30 = vsub.s32 4, %v1408_v18 }
 0x165   :  { %1128 = vmatprep.subr.bf16.mxu1 %v1127_v31  ;;  %v506_v31 = vsub.s32 5, %v1408_v18 }
 0x166   :  { %v503_v33 = vrot.slane %v482_v49, %v502_v30 }
 0x167   :  { %v507_v34 = vrot.slane %v482_v49, %v506_v31 }
 0x168   :  { %1130 = vmatpush1.bf16.msra.mxu1 %v1129_v36 }
 0x169   :  { %1132 = vmatprep.subr.bf16.mxu1 %v1131_v37 }
 0x16c   :  { %1134 = vmatpush1.bf16.msra.mxu1 %v1133_v43 }
 0x16d   :  { %1136 = vmatprep.subr.bf16.mxu1 %v1135_v44 }
 0x170   :  { %1138 = vmatpush1.bf16.msra.mxu1 %v1137_v47 }
 0x173   :  { %726 = vmatmul.mubr.f32.vlgmr.msra.gmra.mrb[2].mxu1 %v1419_v41 }
 0x206   :  { %v585_v55 = vpop.f32.mrb[0].mxu1  ;;  %v656_v56 = vpop.f32.mrb[2].mxu0 }
 0x207   :  { %v586_v57 = vadd.f32 %v585_v55, %v487_v51  ;;  %v657_v41 = vadd.f32 %v656_v56, %v495_v52  ;;  %v587_v58 = vpop.f32.mrb[1].mxu1  ;;  %v658_v59 = vpop.f32.mrb[3].mxu0 }
 0x208   :  { %v588_v60 = vadd.f32 %v587_v58, %v491_v53  ;;  %v659_v61 = vadd.f32 %v658_v59, %v499_v54 }
 0x209   :  { %v899_v62 = vmul.f32 -1.442695, %v586_v57  ;;  %v901_v63 = vmul.f32 -1.442695, %v657_v41 }
 0x20a   :  { %v900_v0 = vmul.f32 -1.442695, %v588_v60  ;;  %v902_v1 = vmul.f32 -1.442695, %v659_v61 }
 0x20b   :  { %1184 = vpow2.f32 %v899_v62 }
 0x20c   :  { %1186 = vpow2.f32 %v901_v63 }
 0x20d   :  { %1188 = vpow2.f32 %v900_v0 }
 0x20e   :  { %1190 = vpow2.f32 %v902_v1 }
 0x215   :  { %v1185_v19 = vpop.eup %1184 }
 0x216   :  { %v1187_v2 = vpop.eup %1186  ;;  %v823_v21 = vadd.f32 1.0, %v1185_v19 }
 0x217   :  { %v1189_v3 = vpop.eup %1188  ;;  %v825_v4 = vadd.f32 1.0, %v1187_v2 }
 0x218   :  { %v1191_v5 = vpop.eup %1190  ;;  %1192 = vrcp.f32 %v823_v21  ;;  %v824_v6 = vadd.f32 1.0, %v1189_v3 }
 0x219   :  { %1194 = vrcp.f32 %v825_v4  ;;  %v826_v7 = vadd.f32 1.0, %v1191_v5 }
 0x21a   :  { %1196 = vrcp.f32 %v824_v6 }
 0x21b   :  { %1198 = vrcp.f32 %v826_v7 }
 0x222   :  { %v1193_v11 = vpop.eup %1192 }
 0x223   :  { %v1195_v13 = vpop.eup %1194 }
 0x224   :  { %v1197_v15 = vpop.eup %1196 }
 0x225   :  { %v1199_v16 = vpop.eup %1198  ;;  %v851_v17 = vcombine.low %v1193_v11, %v1197_v15 }
 0x226   :  { %v852_v20 = vcombine.low %v1195_v13, %v1199_v16  ;;  %v938_v22 = vpop.f32.mrb[4].mxu0 }
 0x227   :  { %v859_v24 = vrot.slane %v851_v17, %v858_v14  ;;  %v939_v25 = vpop.f32.mrb[5].mxu0 }
 0x228   :  { %v866_v26 = vrot.slane %v852_v20, %v858_v14  ;;  %v940_v27 = vadd.f32 %v939_v25, %v938_v22 }
 0x22a   :  { %v867_v28 = vcombine.low %v859_v24, %v866_v26  ;;  %v799_v29 = vadd.f32 %v940_v27, %v511_v23 }
 0x22c   :  { %886 = vst [vmem:[%s1451_s7] sm:$0xff] %v867_v28  ;;  %v905_v32 = vmul.f32 -1.442695, %v799_v29 }
 0x22e   :  { %1200 = vpow2.f32 %v905_v32 }
 0x238   :  { %v1201_v42 = vpop.eup %1200 }
 0x239   :  { %v829_v43 = vadd.f32 1.0, %v1201_v42 }
 0x246   :  { %v727_v35 = vpop.f32.mrb[2].mxu1 }
 0x247   :  { %v728_v36 = vadd.f32 %v727_v35, %v503_v33  ;;  %v729_v37 = vpop.f32.mrb[3].mxu1 }
 0x248   :  { %v730_v38 = vadd.f32 %v729_v37, %v507_v34 }
 0x249   :  { %v903_v39 = vmul.f32 -1.442695, %v728_v36 }
 0x24a   :  { %v904_v40 = vmul.f32 -1.442695, %v730_v38 }
 0x24b   :  { %1202 = vpow2.f32 %v903_v39 }
 0x24c   :  { %1204 = vpow2.f32 %v904_v40 }
 0x24d   :  { %1206 = vrcp.f32 %v829_v43 }
 0x255   :  { %v1203_v44 = vpop.eup %1202 }
 0x256   :  { %v1205_v45 = vpop.eup %1204  ;;  %v827_v46 = vadd.f32 1.0, %v1203_v44 }
 0x257   :  { %v828_v47 = vadd.f32 1.0, %v1205_v45  ;;  %v1207_v18 = vpop.eup %1206 }
 0x258   :  { %1208 = vrcp.f32 %v827_v46  ;;  %v882_v51 = vrot.slane %v1207_v18, %v858_v14 }
 0x259   :  { %1210 = vrcp.f32 %v828_v47 }
 0x262   :  { %v1209_v48 = vpop.eup %1208 }
 0x263   :  { %v1211_v49 = vpop.eup %1210 }
 0x264   :  { %v868_v50 = vcombine.low %v1209_v48, %v1211_v49 }
 0x266   :  { %v875_v52 = vrot.slane %v868_v50, %v858_v14 }
 0x268   :  { %v883_v53 = vcombine.low %v875_v52, %v882_v51 }
 0x26a   :  { %887 = vst [vmem:[%s1451_s7 + $0x8] sm:$0x3f] %v883_v53 }
 0x26b   :  { %892 = vsyncpa [#allocation3], 1 }
 0x26c   :  { %893 = vsyncpa [#allocation5], 1 }
 0x26d   :  { %894 = vsyncpa [#allocation8], 1 }

</bundles_post_ra>
